<compile_context>
chip_gen: v6e
topology: v6e:2x2x1
jax: 0.10.0
libtpu: 0.0.40
codegen_flags: <defaults>
</compile_context>

<pallas_src>
import jax
import jax.numpy as jnp
from jax.experimental import pallas as pl
from jax.experimental.pallas import tpu as pltpu


def fasttext_kernel(ew_ref, e2_ref, e3_ref,
                    w1w_ref, w1b_ref, w1t_ref, b1_ref, w2_ref, b2_ref,
                    logits_ref, probas_ref):
    # fc1 with the mean-pool and the (virtual) concat folded in: each stream
    # is a (TB, L*E) bf16 tile; each weight slab is a (L*E, H) bf16 tile that
    # already contains the 1/L scale and the L-fold repetition of the (E, H)
    # weights, so pooling and the (TB, 3E) concat never materialize.
    h = (jnp.dot(ew_ref[...], w1w_ref[...], preferred_element_type=jnp.float32)
         + jnp.dot(e2_ref[...], w1b_ref[...], preferred_element_type=jnp.float32)
         + jnp.dot(e3_ref[...], w1t_ref[...], preferred_element_type=jnp.float32)
         + b1_ref[...])
    # dropout: identity in eval/inference mode.
    # TODO(synk): training-mode dropout via pltpu.prng_* if ever needed.
    h = jnp.maximum(h, 0.0)                                   # ReLU, (TB, H)

    # fc2 -> logits; class dim left unpadded (block == full trailing dim).
    logits = jnp.dot(h, w2_ref[...],
                     preferred_element_type=jnp.float32) + b2_ref[...]
    logits_ref[...] = logits                                  # (TB, C)

    # softmax over classes; exact divide (approx reciprocal broke 1e-4 tol).
    m = jnp.max(logits, axis=1, keepdims=True)
    ex = jnp.exp(logits - m)
    probas_ref[...] = ex / jnp.sum(ex, axis=1, keepdims=True)


def prepare_fasttext_params(emb_word, emb_ngram2, emb_ngram3,
                            w1, b1, w2, b2, seq_len,
                            emb_dtype=jnp.bfloat16):
    """One-time parameter prep, hoisted out of the per-call path."""
    E = emb_word.shape[1]
    H = w1.shape[1]
    C = w2.shape[1]
    L = int(seq_len)
    w1f = w1.astype(jnp.float32)

    def slab(ws):
        # (E, H) -> (L*E, H): repeat along the flattened sequence axis and
        # fold the 1/L of the mean-pool into the weights (exact in bf16 for
        # power-of-two L).
        return jnp.tile(ws * (1.0 / L), (L, 1)).astype(emb_dtype)

    return dict(
        L=L, E=E, H=H, C=C,
        emb_word=emb_word.astype(emb_dtype),
        emb_ngram2=emb_ngram2.astype(emb_dtype),
        emb_ngram3=emb_ngram3.astype(emb_dtype),
        w1w=slab(w1f[:E]),
        w1b=slab(w1f[E:2 * E]),
        w1t=slab(w1f[2 * E:]),
        b1=b1.astype(jnp.float32).reshape(1, H),
        w2=w2.astype(jnp.float32),
        b2=b2.astype(jnp.float32).reshape(1, C),
    )


def _pick_batch_tile(batch):
    """Largest batch tile (multiple of 8, cap 256) that still leaves >=2 grid
    steps so the 'parallel' axis can be sharded across v7x's two TCs."""
    b8 = pl.cdiv(batch, 8) * 8
    if b8 <= 8:
        return 8
    return int(min(256, max(8, (b8 // 2) // 8 * 8)))


def fasttext_forward(tokens_word, tokens_bigram, tokens_trigram, params,
                     *, block_b=None):
    """Embedding gathers (XLA, bf16 transport) + one batch-tiled Pallas call."""
    B, L = tokens_word.shape
    E, H, C = params["E"], params["H"], params["C"]
    assert L == params["L"], "params were prepared for a different seq_len"
    LE = L * E

    TB = (_pick_batch_tile(B) if block_b is None
          else max(8, (int(block_b) // 8) * 8))
    B_pad = pl.cdiv(B, TB) * TB

    # Pad the tiny int32 id arrays (not the big gathered bf16 tensors).
    pad_id = params["emb_word"].shape[0] - 1      # padding_idx row (valid id)

    def pad_ids(t):
        if B_pad == B:
            return t
        return jnp.pad(t, ((0, B_pad - B), (0, 0)), constant_values=pad_id)

    tw, tb, tt = pad_ids(tokens_word), pad_ids(tokens_bigram), pad_ids(tokens_trigram)

    # Gathers produce (B_pad, L, E) bf16, flattened to lane-dense (B_pad, L*E).
    ew = jnp.take(params["emb_word"], tw, axis=0).reshape(B_pad, LE)
    e2 = jnp.take(params["emb_ngram2"], tb, axis=0).reshape(B_pad, LE)
    e3 = jnp.take(params["emb_ngram3"], tt, axis=0).reshape(B_pad, LE)

    grid = (B_pad // TB,)

    def const2(shape):
        return pl.BlockSpec(shape, lambda i: (0, 0))

    logits, probas = pl.pallas_call(
        fasttext_kernel,
        out_shape=(
            jax.ShapeDtypeStruct((B_pad, C), jnp.float32),
            jax.ShapeDtypeStruct((B_pad, C), jnp.float32),
        ),
        grid_spec=pltpu.PrefetchScalarGridSpec(
            num_scalar_prefetch=0,
            grid=grid,
            in_specs=[
                pl.BlockSpec((TB, LE), lambda i: (i, 0)),
                pl.BlockSpec((TB, LE), lambda i: (i, 0)),
                pl.BlockSpec((TB, LE), lambda i: (i, 0)),
                const2((LE, H)),          # fc1 word slab   (VMEM-resident)
                const2((LE, H)),          # fc1 bigram slab
                const2((LE, H)),          # fc1 trigram slab
                const2((1, H)),           # b1
                const2((H, C)),           # fc2 weight
                const2((1, C)),           # b2
            ],
            out_specs=[
                pl.BlockSpec((TB, C), lambda i: (i, 0)),
                pl.BlockSpec((TB, C), lambda i: (i, 0)),
            ],
        ),
        compiler_params=pltpu.CompilerParams(
            dimension_semantics=("parallel",)),
    )(ew, e2, e3, params["w1w"], params["w1b"], params["w1t"],
      params["b1"], params["w2"], params["b2"])

    return logits[:B], probas[:B]


if __name__ == "__main__":
    # Small config consistent with the module's __init__ / forward:
    #   n_gram_vocab=100, embed=32, hidden_size=32, class_num=8
    #   batch=32, seq_len=8  (batch chosen so the grid has 2 tiles)
    B, L = 32, 8
    V, E, H, C = 100, 32, 32, 8

    key = jax.random.PRNGKey(0)
    k_tok, k_ew, k_e2, k_e3, k_w1, k_b1, k_w2, k_b2 = jax.random.split(key, 8)

    # token indices: x[0], x[2], x[3] in the PyTorch forward
    tok = jax.random.randint(k_tok, (3, B, L), 0, V, dtype=jnp.int32)
    tokens_word, tokens_bigram, tokens_trigram = tok[0], tok[1], tok[2]

    # deterministic parameter init (synthetic weights, not a checkpoint)
    emb_word = jax.random.normal(k_ew, (V, E), jnp.float32) * 0.1
    emb_word = emb_word.at[V - 1].set(0.0)       # padding_idx = n_vocab - 1
    emb_ngram2 = jax.random.normal(k_e2, (V, E), jnp.float32) * 0.1
    emb_ngram3 = jax.random.normal(k_e3, (V, E), jnp.float32) * 0.1

    w1 = jax.random.normal(k_w1, (3 * E, H), jnp.float32) * 0.05   # (in, out)
    b1 = jax.random.normal(k_b1, (H,), jnp.float32) * 0.05
    w2 = jax.random.normal(k_w2, (H, C), jnp.float32) * 0.05
    b2 = jax.random.normal(k_b2, (C,), jnp.float32) * 0.05

    params = prepare_fasttext_params(
        emb_word, emb_ngram2, emb_ngram3, w1, b1, w2, b2, seq_len=L)

    logits, probas = fasttext_forward(
        tokens_word, tokens_bigram, tokens_trigram, params)
    jax.block_until_ready((logits, probas))

    # Pure-JAX reference.  Uses the same bf16-rounded embedding / fc1-weight
    # values the kernel transports (f32 math thereafter) so tolerances stay
    # tight; with L=8 (power of two) the folded 1/L scale is exact in bf16.
    def q(t):
        return t.astype(jnp.bfloat16).astype(jnp.float32)

    ref_emb = jnp.concatenate(
        (jnp.take(q(emb_word), tokens_word, axis=0),
         jnp.take(q(emb_ngram2), tokens_bigram, axis=0),
         jnp.take(q(emb_ngram3), tokens_trigram, axis=0)), axis=-1)
    ref_pool = ref_emb.mean(axis=1)
    ref_h = jnp.maximum(ref_pool @ q(w1) + b1, 0.0)
    ref_logits = ref_h @ w2 + b2
    ref_probas = jax.nn.softmax(ref_logits, axis=1)

    assert jnp.allclose(logits, ref_logits, atol=1e-4, rtol=1e-4), (
        float(jnp.max(jnp.abs(logits - ref_logits))))
    assert jnp.allclose(probas, ref_probas, atol=1e-4, rtol=1e-4), (
        float(jnp.max(jnp.abs(probas - ref_probas))))
    print("KERNEL_OK")
</pallas_src>

<mosaic_0001>
module attributes {stable_mosaic.version = 11 : i64} {
  func.func @fasttext_kernel(%arg0: i32, %arg1: memref<16x256xbf16, #tpu.memory_space<vmem>>, %arg2: memref<16x256xbf16, #tpu.memory_space<vmem>>, %arg3: memref<16x256xbf16, #tpu.memory_space<vmem>>, %arg4: memref<256x32xbf16, #tpu.memory_space<vmem>>, %arg5: memref<256x32xbf16, #tpu.memory_space<vmem>>, %arg6: memref<256x32xbf16, #tpu.memory_space<vmem>>, %arg7: memref<1x32xf32, #tpu.memory_space<vmem>>, %arg8: memref<32x8xf32, #tpu.memory_space<vmem>>, %arg9: memref<1x8xf32, #tpu.memory_space<vmem>>, %arg10: memref<16x8xf32, #tpu.memory_space<vmem>>, %arg11: memref<16x8xf32, #tpu.memory_space<vmem>>) attributes {dimension_semantics = [#tpu.dimension_semantics<parallel>], iteration_bounds = array<i64: 2>, scalar_prefetch = 0 : i64, scratch_operands = 0 : i64, tpu.core_type = #tpu.core_type<tc>, window_params = [{transform_indices = @transform_0, window_bounds = array<i64: 16, 256>}, {transform_indices = @transform_1, window_bounds = array<i64: 16, 256>}, {transform_indices = @transform_2, window_bounds = array<i64: 16, 256>}, {pipeline_mode = #tpu.pipeline_mode<synchronous>, transform_indices = @transform_3, window_bounds = array<i64: 256, 32>}, {pipeline_mode = #tpu.pipeline_mode<synchronous>, transform_indices = @transform_4, window_bounds = array<i64: 256, 32>}, {pipeline_mode = #tpu.pipeline_mode<synchronous>, transform_indices = @transform_5, window_bounds = array<i64: 256, 32>}, {pipeline_mode = #tpu.pipeline_mode<synchronous>, transform_indices = @transform_6, window_bounds = array<i64: 1, 32>}, {pipeline_mode = #tpu.pipeline_mode<synchronous>, transform_indices = @transform_7, window_bounds = array<i64: 32, 8>}, {pipeline_mode = #tpu.pipeline_mode<synchronous>, transform_indices = @transform_8, window_bounds = array<i64: 1, 8>}, {transform_indices = @transform_9, window_bounds = array<i64: 16, 8>}, {transform_indices = @transform_10, window_bounds = array<i64: 16, 8>}]} {
    %c0 = arith.constant 0 : index
    %c0_0 = arith.constant 0 : index
    %0 = vector.load %arg1[%c0, %c0_0] : memref<16x256xbf16, #tpu.memory_space<vmem>>, vector<16x256xbf16>
    %c0_1 = arith.constant 0 : index
    %c0_2 = arith.constant 0 : index
    %1 = vector.load %arg4[%c0_1, %c0_2] : memref<256x32xbf16, #tpu.memory_space<vmem>>, vector<256x32xbf16>
    %cst = arith.constant dense<0.000000e+00> : vector<16x32xf32>
    %2 = tpu.matmul %0, %1, %cst {dimension_numbers = #tpu.dot_dimension_numbers<[1], [0], [0], [1], [0, 0, 1, 1], [], []>} : vector<16x256xbf16>, vector<256x32xbf16>, vector<16x32xf32> -> vector<16x32xf32>
    %c0_3 = arith.constant 0 : index
    %c0_4 = arith.constant 0 : index
    %3 = vector.load %arg2[%c0_3, %c0_4] : memref<16x256xbf16, #tpu.memory_space<vmem>>, vector<16x256xbf16>
    %c0_5 = arith.constant 0 : index
    %c0_6 = arith.constant 0 : index
    %4 = vector.load %arg5[%c0_5, %c0_6] : memref<256x32xbf16, #tpu.memory_space<vmem>>, vector<256x32xbf16>
    %cst_7 = arith.constant dense<0.000000e+00> : vector<16x32xf32>
    %5 = tpu.matmul %3, %4, %cst_7 {dimension_numbers = #tpu.dot_dimension_numbers<[1], [0], [0], [1], [0, 0, 1, 1], [], []>} : vector<16x256xbf16>, vector<256x32xbf16>, vector<16x32xf32> -> vector<16x32xf32>
    %6 = arith.addf %2, %5 : vector<16x32xf32>
    %c0_8 = arith.constant 0 : index
    %c0_9 = arith.constant 0 : index
    %7 = vector.load %arg3[%c0_8, %c0_9] : memref<16x256xbf16, #tpu.memory_space<vmem>>, vector<16x256xbf16>
    %c0_10 = arith.constant 0 : index
    %c0_11 = arith.constant 0 : index
    %8 = vector.load %arg6[%c0_10, %c0_11] : memref<256x32xbf16, #tpu.memory_space<vmem>>, vector<256x32xbf16>
    %cst_12 = arith.constant dense<0.000000e+00> : vector<16x32xf32>
    %9 = tpu.matmul %7, %8, %cst_12 {dimension_numbers = #tpu.dot_dimension_numbers<[1], [0], [0], [1], [0, 0, 1, 1], [], []>} : vector<16x256xbf16>, vector<256x32xbf16>, vector<16x32xf32> -> vector<16x32xf32>
    %10 = arith.addf %6, %9 : vector<16x32xf32>
    %c0_13 = arith.constant 0 : index
    %c0_14 = arith.constant 0 : index
    %11 = vector.load %arg7[%c0_13, %c0_14] : memref<1x32xf32, #tpu.memory_space<vmem>>, vector<1x32xf32>
    %12 = vector.broadcast %11 : vector<1x32xf32> to vector<16x32xf32>
    %13 = arith.addf %10, %12 : vector<16x32xf32>
    %cst_15 = arith.constant 0.000000e+00 : f32
    %14 = vector.broadcast %cst_15 : f32 to vector<16x32xf32>
    %15 = arith.maximumf %13, %14 : vector<16x32xf32>
    %c0_16 = arith.constant 0 : index
    %c0_17 = arith.constant 0 : index
    %16 = vector.load %arg8[%c0_16, %c0_17] : memref<32x8xf32, #tpu.memory_space<vmem>>, vector<32x8xf32>
    %cst_18 = arith.constant dense<0.000000e+00> : vector<16x8xf32>
    %17 = tpu.matmul %15, %16, %cst_18 {dimension_numbers = #tpu.dot_dimension_numbers<[1], [0], [0], [1], [0, 0, 1, 1], [], []>} : vector<16x32xf32>, vector<32x8xf32>, vector<16x8xf32> -> vector<16x8xf32>
    %c0_19 = arith.constant 0 : index
    %c0_20 = arith.constant 0 : index
    %18 = vector.load %arg9[%c0_19, %c0_20] : memref<1x8xf32, #tpu.memory_space<vmem>>, vector<1x8xf32>
    %19 = vector.broadcast %18 : vector<1x8xf32> to vector<16x8xf32>
    %20 = arith.addf %17, %19 : vector<16x8xf32>
    %c0_21 = arith.constant 0 : index
    %c0_22 = arith.constant 0 : index
    %21 = vector.load %arg10[%c0_21, %c0_22] : memref<16x8xf32, #tpu.memory_space<vmem>>, vector<16x8xf32>
    tpu.vector_store %arg10[%c0_21, %c0_22], %20 {strides = array<i32>} : memref<16x8xf32, #tpu.memory_space<vmem>>, vector<16x8xf32>,
    %cst_23 = arith.constant dense<0xFF800000> : vector<16xf32>
    %22 = vector.multi_reduction <maximumf>, %20, %cst_23 [1] : vector<16x8xf32> to vector<16xf32>
    %23 = vector.shape_cast %22 : vector<16xf32> to vector<16x1xf32>
    %24 = vector.broadcast %23 : vector<16x1xf32> to vector<16x8xf32>
    %25 = arith.subf %20, %24 : vector<16x8xf32>
    %26 = math.exp %25 : vector<16x8xf32>
    %cst_24 = arith.constant dense<0.000000e+00> : vector<16xf32>
    %27 = vector.multi_reduction <add>, %26, %cst_24 [1] : vector<16x8xf32> to vector<16xf32>
    %28 = vector.shape_cast %27 : vector<16xf32> to vector<16x1xf32>
    %29 = vector.broadcast %28 : vector<16x1xf32> to vector<16x8xf32>
    %30 = arith.divf %26, %29 : vector<16x8xf32>
    %c0_25 = arith.constant 0 : index
    %c0_26 = arith.constant 0 : index
    %31 = vector.load %arg11[%c0_25, %c0_26] : memref<16x8xf32, #tpu.memory_space<vmem>>, vector<16x8xf32>
    tpu.vector_store %arg11[%c0_25, %c0_26], %30 {strides = array<i32>} : memref<16x8xf32, #tpu.memory_space<vmem>>, vector<16x8xf32>,
    return
  }
  func.func @transform_0(%arg0: i32) -> (i32, i32) {
    %c0_i32 = arith.constant 0 : i32
    %c0_i32_0 = arith.constant 0 : i32
    return %arg0, %c0_i32 : i32, i32
  }
  func.func @transform_1(%arg0: i32) -> (i32, i32) {
    %c0_i32 = arith.constant 0 : i32
    %c0_i32_0 = arith.constant 0 : i32
    return %arg0, %c0_i32 : i32, i32
  }
  func.func @transform_2(%arg0: i32) -> (i32, i32) {
    %c0_i32 = arith.constant 0 : i32
    %c0_i32_0 = arith.constant 0 : i32
    return %arg0, %c0_i32 : i32, i32
  }
  func.func @transform_3(%arg0: i32) -> (i32, i32) {
    %c0_i32 = arith.constant 0 : i32
    %c0_i32_0 = arith.constant 0 : i32
    %c0_i32_1 = arith.constant 0 : i32
    return %c0_i32, %c0_i32_0 : i32, i32
  }
  func.func @transform_4(%arg0: i32) -> (i32, i32) {
    %c0_i32 = arith.constant 0 : i32
    %c0_i32_0 = arith.constant 0 : i32
    %c0_i32_1 = arith.constant 0 : i32
    return %c0_i32, %c0_i32_0 : i32, i32
  }
  func.func @transform_5(%arg0: i32) -> (i32, i32) {
    %c0_i32 = arith.constant 0 : i32
    %c0_i32_0 = arith.constant 0 : i32
    %c0_i32_1 = arith.constant 0 : i32
    return %c0_i32, %c0_i32_0 : i32, i32
  }
  func.func @transform_6(%arg0: i32) -> (i32, i32) {
    %c0_i32 = arith.constant 0 : i32
    %c0_i32_0 = arith.constant 0 : i32
    %c0_i32_1 = arith.constant 0 : i32
    return %c0_i32, %c0_i32_0 : i32, i32
  }
  func.func @transform_7(%arg0: i32) -> (i32, i32) {
    %c0_i32 = arith.constant 0 : i32
    %c0_i32_0 = arith.constant 0 : i32
    %c0_i32_1 = arith.constant 0 : i32
    return %c0_i32, %c0_i32_0 : i32, i32
  }
  func.func @transform_8(%arg0: i32) -> (i32, i32) {
    %c0_i32 = arith.constant 0 : i32
    %c0_i32_0 = arith.constant 0 : i32
    %c0_i32_1 = arith.constant 0 : i32
    return %c0_i32, %c0_i32_0 : i32, i32
  }
  func.func @transform_9(%arg0: i32) -> (i32, i32) {
    %c0_i32 = arith.constant 0 : i32
    %c0_i32_0 = arith.constant 0 : i32
    return %arg0, %c0_i32 : i32, i32
  }
  func.func @transform_10(%arg0: i32) -> (i32, i32) {
    %c0_i32 = arith.constant 0 : i32
    %c0_i32_0 = arith.constant 0 : i32
    return %arg0, %c0_i32 : i32, i32
  }
}

</mosaic_0001>

<bundles_post_ra>
// kernel: tpu_custom_call.1
= control target key start
LH: loop header
LB: loop body
LE: loop exit
PB: predicated region body
PF: predicated region fallthrough
CT: control target
= control target key end

     0   :  { %s1521_s13 = smov 0   ;;  %s1726_s0 = inlined_call_operand.vmem [shape: bf16[32,256], index: 0, kind: input, shape index: {}]   ;;  %s1727_s1 = inlined_call_operand.vmem [shape: bf16[32,256], index: 1, kind: input, shape index: {}]   ;;  %s1728_s2 = inlined_call_operand.vmem [shape: bf16[32,256], index: 2, kind: input, shape index: {}]   ;;  %s1729_s3 = inlined_call_operand.vmem [shape: bf16[256,32], index: 3, kind: input, shape index: {}]   ;;  %s1730_s4 = inlined_call_operand.vmem [shape: bf16[256,32], index: 4, kind: input, shape index: {}]   ;;  %s1731_s5 = inlined_call_operand.vmem [shape: bf16[256,32], index: 5, kind: input, shape index: {}]   ;;  %s1732_s6 = inlined_call_operand.vmem [shape: f32[1,32], index: 6, kind: input, shape index: {}]   ;;  %s1733_s7 = inlined_call_operand.vmem [shape: f32[32,8], index: 7, kind: input, shape index: {}]   ;;  %s1734_s8 = inlined_call_operand.vmem [shape: f32[1,8], index: 8, kind: input, shape index: {}]   ;;  %s1735_s9 = inlined_call_operand.vmem [shape: f32[32,8], index: 9, kind: output, shape index: {0}]   ;;  %s1736_s10 = inlined_call_operand.vmem [shape: f32[32,8], index: 10, kind: output, shape index: {1}]  }
   0x1 LB: > { %s1221_s14 = sadd.s32 4294967295, %s1464_s13   ;;  %p1225_p0 = scmp.ge.s32.totalorder %s1464_s13, 1  ;;  %s1464_s13 = sphi %s1521_s13, %s21_s13  }
   0x2   : > { %p341_p1 = scmp.lt.s32.totalorder %s1464_s13, 3 }
   0x4   : > { %p342_p2 = pnand %p1225_p0, %p341_p1 }
   0x5   : > { %s1226_s29 = sshll.u32 (!%p342_p2), %s1221_s14, 1 }
   0x6   : > { %345 = sbr.rel (%p342_p2) target bundleno = 798 (0x31e), region = 56  ;;  %p398_p3 = scmp.lt.s32.totalorder (!%p342_p2), %s1226_s29, 3 }
   0xb   : > { %v1393_v0 = vld [vmem:[%s1730_s4 + $0x78] sm:$0xff]   ;;  %v1397_v4 = vld [vmem:[%s1730_s4 + $0x70] sm:$0xff]   ;;  %v1401_v8 = vld [vmem:[%s1730_s4 + $0x68] sm:$0xff]   ;;  %s1738_s29 = smov (!%p398_p3, %s1226_s29), 3  ;;  %vm998_vm0 = vcmask 261120   ;;  %vm1080_vm1 = vcmask 64512  }
   0xc   : > { %v1394_v1 = vld [vmem:[%s1729_s3 + $0x78] sm:$0xff]   ;;  %1302 = vmatprep.subr.bf16.mxu0 %v1393_v0  ;;  %v1398_v5 = vld [vmem:[%s1729_s3 + $0x70] sm:$0xff]   ;;  %v1402_v9 = vld [vmem:[%s1729_s3 + $0x68] sm:$0xff]   ;;  %s1612_s16 = sshll.u32 %s1738_s29, 3 }
   0xd   : > { %v1395_v2 = vld [vmem:[%s1730_s4 + $0x38] sm:$0xff]   ;;  %1324 = vmatprep.subr.bf16.mxu1 %v1394_v1  ;;  %v1399_v6 = vld [vmem:[%s1730_s4 + $0x30] sm:$0xff]   ;;  %v1403_v10 = vld [vmem:[%s1730_s4 + $0x28] sm:$0xff]   ;;  %s409_s23 = scalar_lea.vmem %s1727_s1, %s1612_s16  ;;  %s402_s11 = scalar_lea.vmem %s1726_s0, %s1612_s16 }
   0xe   : > { %v1396_v3 = vld [vmem:[%s1729_s3 + $0x38] sm:$0xff]   ;;  %1303 = vmatpush3.bf16.msra.mxu0 %v1395_v2  ;;  %v1400_v7 = vld [vmem:[%s1729_s3 + $0x30] sm:$0xff]   ;;  %v1404_v11 = vld [vmem:[%s1729_s3 + $0x28] sm:$0xff]   ;;  %s416_s17 = scalar_lea.vmem %s1728_s2, %s1612_s16  ;;  %s422_s26 = scalar_lea.vmem %s1735_s9, %s1612_s16 }
   0xf   : > { %1325 = vmatpush3.bf16.msra.mxu1 %v1396_v3  ;;  %1304 = vmatprep.subr.bf16.mxu0 %v1397_v4  ;;  %v1405_v12 = vld [vmem:[%s1730_s4 + $0x60] sm:$0xff]   ;;  %v1409_v16 = vld [vmem:[%s1730_s4 + $0x58] sm:$0xff]   ;;  %v1413_v20 = vld [vmem:[%s1730_s4 + $0x50] sm:$0xff]   ;;  %s428_s30 = scalar_lea.vmem %s1736_s10, %s1612_s16 }
  0x10   : > { %1326 = vmatprep.subr.bf16.mxu1 %v1398_v5  ;;  %v1406_v13 = vld [vmem:[%s1729_s3 + $0x60] sm:$0xff]   ;;  %v1410_v17 = vld [vmem:[%s1729_s3 + $0x58] sm:$0xff]   ;;  %v1414_v21 = vld [vmem:[%s1729_s3 + $0x50] sm:$0xff]  }
  0x11   : > { %v1407_v14 = vld [vmem:[%s1730_s4 + $0x20] sm:$0xff]   ;;  %v1411_v18 = vld [vmem:[%s1730_s4 + $0x18] sm:$0xff]   ;;  %v1415_v22 = vld [vmem:[%s1730_s4 + $0x10] sm:$0xff]  }
  0x12   : > { %1305 = vmatpush3.bf16.msra.mxu0 %v1399_v6  ;;  %v1408_v15 = vld [vmem:[%s1729_s3 + $0x20] sm:$0xff]   ;;  %v1412_v19 = vld [vmem:[%s1729_s3 + $0x18] sm:$0xff]   ;;  %v1416_v23 = vld [vmem:[%s1729_s3 + $0x10] sm:$0xff]  }
  0x13   : > { %1327 = vmatpush3.bf16.msra.mxu1 %v1400_v7  ;;  %1306 = vmatprep.subr.bf16.mxu0 %v1401_v8  ;;  %v1417_v24 = vld [vmem:[%s1730_s4 + $0x48] sm:$0xff]   ;;  %v1421_v28 = vld [vmem:[%s1730_s4 + $0x40] sm:$0xff]   ;;  %v1431_v36 = vld [vmem:[%s1731_s5 + $0x78] sm:$0xff]  }
  0x14   : > { %1328 = vmatprep.subr.bf16.mxu1 %v1402_v9  ;;  %v1418_v25 = vld [vmem:[%s1729_s3 + $0x48] sm:$0xff]   ;;  %v1422_v29 = vld [vmem:[%s1729_s3 + $0x40] sm:$0xff]   ;;  %v1432_v37 = vld [vmem:[%s1731_s5 + $0x38] sm:$0xff]  }
  0x15   : > { %v1419_v26 = vld [vmem:[%s1730_s4 + $0x8] sm:$0xff]   ;;  %v1423_v30 = vld [vmem:[%s1730_s4] sm:$0xff]   ;;  %v1433_v38 = vld [vmem:[%s1731_s5 + $0x70] sm:$0xff]  }
  0x16   : > { %1307 = vmatpush3.bf16.msra.mxu0 %v1403_v10  ;;  %v1420_v27 = vld [vmem:[%s1729_s3 + $0x8] sm:$0xff]   ;;  %v1424_v31 = vld [vmem:[%s1729_s3] sm:$0xff]   ;;  %v1434_v39 = vld [vmem:[%s1731_s5 + $0x30] sm:$0xff]  }
  0x17   : > { %1329 = vmatpush3.bf16.msra.mxu1 %v1404_v11  ;;  %1308 = vmatprep.subr.bf16.mxu0 %v1405_v12  ;;  %v1425_v32 = vld [vmem:[%s409_s23] ss:$8 sps:$4 sm:$0xff]   ;;  %v1427_v33 = vld [vmem:[%s409_s23 + $0x4] ss:$8 sps:$4 sm:$0xff]   ;;  %v1439_v44 = vld [vmem:[%s1731_s5 + $0x58] sm:$0xff]  }
  0x18   : > { %1330 = vmatprep.subr.bf16.mxu1 %v1406_v13  ;;  %v1428_v34 = vld [vmem:[%s402_s11] ss:$8 sps:$4 sm:$0xff]   ;;  %v1430_v35 = vld [vmem:[%s402_s11 + $0x4] ss:$8 sps:$4 sm:$0xff]   ;;  %637 = vmatprep.mubr.bf16.mxu0 %v1427_v33  ;;  %v1440_v45 = vld [vmem:[%s1731_s5 + $0x18] sm:$0xff]  }
  0x19   : > { %784 = vmatprep.mubr.bf16.mxu1 %v1430_v35  ;;  %v1435_v40 = vld [vmem:[%s1731_s5 + $0x68] sm:$0xff]   ;;  %v1437_v42 = vld [vmem:[%s1731_s5 + $0x60] sm:$0xff]   ;;  %v1441_v46 = vld [vmem:[%s1731_s5 + $0x50] sm:$0xff]  }
  0x1a   : > { %1309 = vmatpush3.bf16.msra.mxu0 %v1407_v14  ;;  %v1436_v41 = vld [vmem:[%s1731_s5 + $0x28] sm:$0xff]   ;;  %v1438_v43 = vld [vmem:[%s1731_s5 + $0x20] sm:$0xff]   ;;  %v1442_v48 = vld [vmem:[%s1731_s5 + $0x10] sm:$0xff]  }
  0x1b   : > { %1331 = vmatpush3.bf16.msra.mxu1 %v1408_v15  ;;  %1310 = vmatprep.subr.bf16.mxu0 %v1409_v16  ;;  %v1449_v47 = vld [vmem:[%s416_s17 + $0x4] ss:$8 sps:$4 sm:$0xff]   ;;  %v1447_v53 = vld [vmem:[%s416_s17] ss:$8 sps:$4 sm:$0xff]   ;;  %v990_v54 = vld [vmem:[%s1733_s7 + $0x18] sm:$0xff] }
  0x1c   : > { %1332 = vmatprep.subr.bf16.mxu1 %v1410_v17  ;;  %v1443_v49 = vld [vmem:[%s1731_s5 + $0x48] sm:$0xff]   ;;  %v1445_v51 = vld [vmem:[%s1731_s5 + $0x40] sm:$0xff]   ;;  %v989_v55 = vld [vmem:[%s1733_s7 + $0x10] sm:$0xff] }
  0x1d   : > { %v1444_v50 = vld [vmem:[%s1731_s5 + $0x8] sm:$0xff]   ;;  %v1446_v52 = vld [vmem:[%s1731_s5] sm:$0xff]  }
  0x1e   : > { %1311 = vmatpush3.bf16.msra.mxu0 %v1411_v18  ;;  %v988_v56 = vld [vmem:[%s1733_s7 + $0x8] sm:$0xff]  ;;  %v987_v57 = vld [vmem:[%s1733_s7] sm:$0xff] }
  0x1f   : > { %1333 = vmatpush3.bf16.msra.mxu1 %v1412_v19  ;;  %1312 = vmatprep.subr.bf16.mxu0 %v1413_v20  ;;  %v1293_v10 = vld [vmem:[%s1732_s6] ss:$0 sm:$0xff] }
  0x20   : > { %1334 = vmatprep.subr.bf16.mxu1 %v1414_v21 }
  0x22   : > { %1313 = vmatpush3.bf16.msra.mxu0 %v1415_v22  ;;  %v1294_v22 = vld [vmem:[%s1734_s8] ss:$0 sm:$0xff] }
  0x23   : > { %1335 = vmatpush3.bf16.msra.mxu1 %v1416_v23  ;;  %1314 = vmatprep.subr.bf16.mxu0 %v1417_v24 }
  0x24   : > { %1336 = vmatprep.subr.bf16.mxu1 %v1418_v25 }
  0x26   : > { %1315 = vmatpush3.bf16.msra.mxu0 %v1419_v26 }
  0x27   : > { %1337 = vmatpush3.bf16.msra.mxu1 %v1420_v27  ;;  %1316 = vmatprep.subr.bf16.mxu0 %v1421_v28 }
  0x28   : > { %1338 = vmatprep.subr.bf16.mxu1 %v1422_v29 }
  0x2a   : > { %1317 = vmatpush3.bf16.msra.mxu0 %v1423_v30 }
  0x2b   : > { %1339 = vmatpush3.bf16.msra.mxu1 %v1424_v31  ;;  %1346 = vmatprep.subr.bf16.mxu0 %v1431_v36 }
  0x2c   : > { %1374 = vmatprep.subr.mxu1 %v990_v54 }
  0x2d   : > { %638 = vmatmul.mubr.bf16.vlgmr.msra.gmra.mxu0 %v1425_v32 }
  0x2e   : > { %785 = vmatmul.mubr.bf16.vlgmr.msra.gmra.mxu1 %v1428_v34  ;;  %1347 = vmatpush3.bf16.msra.mxu0 %v1432_v37 }
  0x2f   : > { %1348 = vmatprep.subr.bf16.mxu0 %v1433_v38  ;;  %965 = vmatprep.mubr.bf16.mxu0 %v1449_v47 }
  0x30   : > { %1375 = vmatpush3.msra.mxu1 %v990_v54 }
  0x31   : > { %1376 = vmatprep.subr.mxu1 %v989_v55 }
  0x32   : > { %1349 = vmatpush3.bf16.msra.mxu0 %v1434_v39  ;;  %1377 = vmatpush3.msra.mxu1 %v989_v55 }
  0x33   : > { %1350 = vmatprep.subr.bf16.mxu0 %v1435_v40  ;;  %1378 = vmatprep.subr.mxu1 %v988_v56 }
  0x34   : > { %1379 = vmatpush3.msra.mxu1 %v988_v56 }
  0x35   : > { %1380 = vmatprep.subr.mxu1 %v987_v57 }
  0x36   : > { %1351 = vmatpush3.bf16.msra.mxu0 %v1436_v41  ;;  %1381 = vmatpush3.msra.mxu1 %v987_v57 }
  0x37   : > { %1352 = vmatprep.subr.bf16.mxu0 %v1437_v42 }
  0x3a   : > { %1353 = vmatpush3.bf16.msra.mxu0 %v1438_v43 }
  0x3b   : > { %1354 = vmatprep.subr.bf16.mxu0 %v1439_v44 }
  0x3e   : > { %1355 = vmatpush3.bf16.msra.mxu0 %v1440_v45 }
  0x3f   : > { %1356 = vmatprep.subr.bf16.mxu0 %v1441_v46 }
  0x42   : > { %1357 = vmatpush3.bf16.msra.mxu0 %v1442_v48 }
  0x43   : > { %1358 = vmatprep.subr.bf16.mxu0 %v1443_v49 }
  0x46   : > { %1359 = vmatpush3.bf16.msra.mxu0 %v1444_v50 }
  0x47   : > { %1360 = vmatprep.subr.bf16.mxu0 %v1445_v51 }
  0x4a   : > { %1361 = vmatpush3.bf16.msra.mxu0 %v1446_v52 }
  0x4d   : > { %966 = vmatmul.mubr.bf16.vlgmr.msra.gmra.mxu0 %v1447_v53 }
  0xed   : > { %v1318_v58 = vpop.f32.mrf.mxu0 }
  0xee   : > { %v1340_v59 = vpop.f32.mrf.mxu1 }
  0xef   : > { %v1319_v60 = vpop.f32.mrf.mxu0 }
  0xf0   : > { %v1341_v61 = vpop.f32.mrf.mxu1  ;;  %v1320_v1 = vadd.f32 %v1319_v60, %v1318_v58 }
  0xf1   : > { %v1321_v62 = vpop.f32.mrf.mxu0  ;;  %v1342_v2 = vadd.f32 %v1341_v61, %v1340_v59 }
  0xf2   : > { %v1343_v63 = vpop.f32.mrf.mxu1 }
  0xf3   : > { %v1322_v0 = vpop.f32.mrf.mxu0  ;;  %v787_v6 = vadd.f32 %v1342_v2, %v1320_v1 }
  0xf4   : > { %v1344_v3 = vpop.f32.mrf.mxu1  ;;  %v1323_v7 = vadd.f32 %v1322_v0, %v1321_v62 }
  0xf5   : > { %v1345_v8 = vadd.f32 %v1344_v3, %v1343_v63 }
  0xf7   : > { %v790_v14 = vadd.f32 %v1345_v8, %v1323_v7 }
 0x10d   : > { %v1362_v4 = vpop.f32.mrf.mxu0 }
 0x10f   : > { %v1363_v5 = vpop.f32.mrf.mxu0 }
 0x110   : > { %v1364_v9 = vadd.f32 %v1363_v5, %v1362_v4 }
 0x111   : > { %v1365_v11 = vpop.f32.mrf.mxu0 }
 0x112   : > { %v974_v12 = vadd.f32 %v1364_v9, %v787_v6 }
 0x113   : > { %v1366_v13 = vpop.f32.mrf.mxu0 }
 0x114   : > { %v983_v15 = vadd.f32 %v1293_v10, %v974_v12  ;;  %v1367_v16 = vadd.f32 %v1366_v13, %v1365_v11 }
 0x116   : > { %v985_v17 = vmax.f32 %v983_v15, 0.0  ;;  %v975_v18 = vadd.f32 %v1367_v16, %v790_v14 }
 0x118   : > { %v984_v19 = vadd.f32 %v1293_v10, %v975_v18  ;;  %1382 = vmatprep.mubr.msk.f32.mxu1 %vm998_vm0, %v985_v17 }
 0x11a   : > { %v986_v20 = vmax.f32 %v984_v19, 0.0 }
 0x11c   : > { %1383 = vmatmul.mubr.msk.f32.vlgmr.msra.gmra.mxu1 %vm998_vm0, %v986_v20 }
 0x1dc   : > { %v1384_v21 = vpop.f32.mrf.mxu1 }
 0x1dd   : > { %v1077_v25 = vadd.f32 %v1384_v21, %v1294_v22 }
 0x1de   : > { %v1071_v23 = vpop.f32.mrf.mxu1 }
 0x1df   : > { %v1072_v24 = vadd.f32 %v1294_v22, %v1071_v23  ;;  %1082 = vst.msk [vmem:[%s422_s26 + $0x8] sm:$0xff] %vm1080_vm1, %v1077_v25  ;;  %v1086_v27 = vsel %vm1080_vm1, %v1077_v25, -inf }
 0x1e1   : > { %1081 = vst.msk [vmem:[%s422_s26] sm:$0xff] %vm1080_vm1, %v1072_v24  ;;  %v1083_v26 = vsel %vm1080_vm1, %v1072_v24, -inf }
 0x1e2   : > { %1084 = vmax.xlane.f32.xlu0 %v1083_v26 }
 0x1e6   : > { %1087 = vmax.xlane.f32.xlu0 %v1086_v27 }
 0x26b   : > { %v1085_v28 = vpop.xlane.xlu0 %1084 }
 0x26c   : > { %v1089_v29 = vsub.f32 %v1072_v24, %v1085_v28 }
 0x26e   : > { %v1091_v30 = vmul.f32 1.442695, %v1089_v29 }
 0x26f   : > { %v1088_v31 = vpop.xlane.xlu0 %1087 }
 0x270   : > { %1450 = vpow2.f32 %v1091_v30  ;;  %v1090_v32 = vsub.f32 %v1077_v25, %v1088_v31 }
 0x272   : > { %v1093_v33 = vmul.f32 1.442695, %v1090_v32 }
 0x274   : > { %1452 = vpow2.f32 %v1093_v33 }
 0x27d   : > { %v1451_v34 = vpop.eup %1450 }
 0x27e   : > { %v1095_v35 = vsel %vm1080_vm1, %v1451_v34, 0.0 }
 0x27f   : > { %1096 = vadd.xlane.f32.xlu1 %v1095_v35 }
 0x281   : > { %v1453_v36 = vpop.eup %1452 }
 0x282   : > { %v1098_v37 = vsel %vm1080_vm1, %v1453_v36, 0.0 }
 0x283   : > { %1099 = vadd.xlane.f32.xlu1 %v1098_v37 }
 0x308   : > { %v1097_v38 = vpop.xlane.xlu1 %1096 }
 0x309   : > { %1454 = vrcp.f32 %v1097_v38 }
 0x30c   : > { %v1100_v39 = vpop.xlane.xlu1 %1099 }
 0x30d   : > { %1456 = vrcp.f32 %v1100_v39 }
 0x316   : > { %v1455_v40 = vpop.eup %1454 }
 0x317   : > { %v1102_v41 = vmul.f32 %v1455_v40, %v1451_v34 }
 0x319   : > { %1105 = vst.msk [vmem:[%s428_s30] sm:$0xff] %vm1080_vm1, %v1102_v41 }
 0x31a   : > { %v1457_v42 = vpop.eup %1456 }
 0x31b   : > { %v1104_v43 = vmul.f32 %v1457_v42, %v1453_v36 }
 0x31d   : > { %1106 = vst.msk [vmem:[%s428_s30 + $0x8] sm:$0xff] %vm1080_vm1, %v1104_v43 }
 0x31e PF: > { %s21_s13 = sadd.s32 1, %s1464_s13  }
 0x31f   : > { %p18_p4 = scmp.ge.s32.totalorder %s21_s13, 4  }
 0x321   :  { %20 = sbr.rel (!%p18_p4) target bundleno = 1 (0x1), region = 104 }

</bundles_post_ra>
